<compile_context>
chip_gen: v5e
topology: v5e:2x2
jax: 0.10.0
libtpu: 0.0.40
codegen_flags: <defaults>
</compile_context>

<pallas_src>
import jax
import jax.numpy as jnp
from jax import lax
from jax.experimental import pallas as pl
from jax.experimental.pallas import tpu as pltpu


def _round_up(a, b):
    return (a + b - 1) // b * b


def make_decoder_layer(B, C_in, C_out, L, stride, kernel_size, eps=1e-5,
                       compute_dtype=jnp.bfloat16):
    s = int(stride)
    K = int(kernel_size)
    M = -(-K // s)                       # taps per output residue class (ceil(K/s))
    L_out = (L - 1) * s + K
    L_eff = L + M - 1                    # per-residue output length (covers all of L_out)
    C_pad = _round_up(C_out, 8)          # sublane-aligned channels per residue block
    R = s * C_pad                        # fused output rows
    Kred = M * C_in                      # fused matmul reduction dim
    Kred_pad = _round_up(Kred, 8)

    # Lane-dense tiling of the folded batch*time axis (always a multiple of 128).
    N = B * L_eff
    N128 = _round_up(N, 128)
    itemsize = jnp.dtype(compute_dtype).itemsize
    TN = 128
    for cand in (1024, 512, 256):
        if N128 % cand == 0 or N128 <= cand:
            tile_cols = min(cand, N128)
            # double-buffered x tile + f32 out tile must stay well under VMEM
            vmem_est = 2 * tile_cols * (Kred_pad * itemsize + R * 4)
            if vmem_est <= 8 * 1024 * 1024:
                TN = tile_cols
                break
    N_pad = _round_up(N128, TN)
    grid = (N_pad // TN,)
    inv_c = 1.0 / float(C_out)

    def kernel(w_ref, x_ref, b_ref, g_ref, beta_ref, o_ref):
        # Single fused MXU matmul covers every kernel tap and every batch element
        # in this column tile; accumulation in f32.
        z = jnp.dot(w_ref[...], x_ref[...],
                    preferred_element_type=jnp.float32)             # (R, TN)
        y = z + b_ref[...]                                          # bias, bcast over lanes
        g = g_ref[...]
        be = beta_ref[...]
        # LayerNorm over the C_out channels of each residue block (static unroll over
        # stride, which is small).  Pad rows are exactly zero (zero weights + zero bias),
        # so dividing by the true C_out keeps the statistics exact.
        for r in range(s):
            lo, hi = r * C_pad, (r + 1) * C_pad
            yr = y[lo:hi, :]
            mean = jnp.sum(yr, axis=0, keepdims=True) * inv_c
            ex2 = jnp.sum(yr * yr, axis=0, keepdims=True) * inv_c
            var = jnp.maximum(ex2 - mean * mean, 0.0)
            yn = (yr - mean) * lax.rsqrt(var + eps)
            yn = yn * g[lo:hi, :] + be[lo:hi, :]
            o_ref[lo:hi, :] = jnp.maximum(yn, 0.0)

    grid_spec = pltpu.PrefetchScalarGridSpec(
        num_scalar_prefetch=0,
        grid=grid,
        in_specs=[
            # Grid-invariant operands (weights / LN params) use constant index_maps,
            # so Pallas keeps them resident and does not re-fetch per step.
            pl.BlockSpec((R, Kred_pad), lambda n: (0, 0)),          # fused deconv weights
            pl.BlockSpec((Kred_pad, TN), lambda n: (0, n)),         # folded/shifted input
            pl.BlockSpec((R, 1), lambda n: (0, 0)),                 # bias
            pl.BlockSpec((R, 1), lambda n: (0, 0)),                 # LN gamma
            pl.BlockSpec((R, 1), lambda n: (0, 0)),                 # LN beta
        ],
        out_specs=pl.BlockSpec((R, TN), lambda n: (0, n)),
    )

    pallas_fn = pl.pallas_call(
        kernel,
        out_shape=jax.ShapeDtypeStruct((R, N_pad), jnp.float32),
        grid_spec=grid_spec,
        compiler_params=pltpu.CompilerParams(
            dimension_semantics=("parallel",)),
    )

    @jax.jit
    def apply(x, w, bias, gamma, beta):
        f32 = jnp.float32
        x = x.astype(f32)

        # X_big[m*C_in + i, b*L_eff + q] = x[b, i, q - m]   (0 outside [0, L))
        x_pad = jnp.pad(x, ((0, 0), (0, 0), (M - 1, L_eff - L)))
        shifts = [x_pad[:, :, (M - 1 - m):(M - 1 - m) + L_eff] for m in range(M)]
        xb = jnp.stack(shifts, axis=0)                              # (M, B, C_in, L_eff)
        xb = jnp.transpose(xb, (0, 2, 1, 3)).reshape(Kred, N)
        xb = jnp.pad(xb, ((0, Kred_pad - Kred), (0, N_pad - N))).astype(compute_dtype)

        # W_big[r*C_pad + c, m*C_in + i] = w[i, c, r + m*s]   (c < C_out; 0 elsewhere)
        wk = jnp.transpose(w.astype(f32), (2, 1, 0))                # (K, C_out, C_in)
        wk = jnp.pad(wk, ((0, s * M - K), (0, 0), (0, 0)))          # (s*M, C_out, C_in)
        wk = jnp.transpose(wk.reshape(M, s, C_out, C_in),
                           (1, 2, 0, 3))                            # (s, C_out, M, C_in)
        wk = jnp.pad(wk, ((0, 0), (0, C_pad - C_out), (0, 0), (0, 0)))
        w_big = wk.reshape(R, Kred)
        w_big = jnp.pad(w_big, ((0, 0), (0, Kred_pad - Kred))).astype(compute_dtype)

        def expand(p):                                              # per-channel -> fused rows
            p = jnp.pad(p.astype(f32), (0, C_pad - C_out))
            return jnp.tile(p, s).reshape(R, 1)

        b_big, g_big, beta_big = expand(bias), expand(gamma), expand(beta)

        out = pallas_fn(w_big, xb, b_big, g_big, beta_big)          # (R, N_pad) f32
        out = out[:, :N].reshape(s, C_pad, B, L_eff)[:, :C_out]     # drop pad channels
        out = jnp.transpose(out, (2, 1, 3, 0)).reshape(B, C_out, L_eff * s)
        return out[:, :, :L_out]

    return apply


def reference_decoder_layer(x, w, bias, gamma, beta, stride, eps=1e-5):
    """Pure-JAX reference mirroring the PyTorch forward exactly (f32)."""
    B, C_in, L = x.shape
    _, C_out, K = w.shape
    L_out = (L - 1) * stride + K
    out = jnp.zeros((B, C_out, L_out), jnp.float32)
    for k in range(K):
        contrib = jnp.einsum("bcl,co->bol", x, w[:, :, k])
        out = out.at[:, :, k:k + (L - 1) * stride + 1:stride].add(contrib)
    out = out + bias[None, :, None]
    h = jnp.transpose(out, (0, 2, 1))                       # (B, L_out, C_out)
    mean = jnp.mean(h, axis=-1, keepdims=True)
    var = jnp.mean((h - mean) ** 2, axis=-1, keepdims=True)
    h = (h - mean) / jnp.sqrt(var + eps) * gamma + beta
    h = jnp.transpose(h, (0, 2, 1))                         # back to (B, C_out, L_out)
    return jnp.maximum(h, 0.0)


if __name__ == "__main__":
    # Small shapes consistent with DecoderLayer(in_channel, out_channel, stride, kernel_size)
    B, C_in, C_out, L = 2, 8, 8, 16
    stride, K = 2, 4

    key = jax.random.PRNGKey(0)
    kx, kw, kb, kg, kbeta = jax.random.split(key, 5)

    x = jax.random.normal(kx, (B, C_in, L), dtype=jnp.float32)
    # ConvTranspose1d weight layout: (in_channels, out_channels, kernel_size)
    w = jax.random.normal(kw, (C_in, C_out, K), dtype=jnp.float32) / jnp.sqrt(1.0 * C_in * K)
    bias = 0.1 * jax.random.normal(kb, (C_out,), dtype=jnp.float32)
    gamma = 1.0 + 0.1 * jax.random.normal(kg, (C_out,), dtype=jnp.float32)
    beta = 0.1 * jax.random.normal(kbeta, (C_out,), dtype=jnp.float32)

    L_out = (L - 1) * stride + K
    ref = reference_decoder_layer(x, w, bias, gamma, beta, stride)

    # f32 MXU path: tight check against the reference.
    dec_f32 = make_decoder_layer(B, C_in, C_out, L, stride, K, compute_dtype=jnp.float32)
    out_f32 = jax.block_until_ready(dec_f32(x, w, bias, gamma, beta))
    assert out_f32.shape == (B, C_out, L_out)
    assert jnp.allclose(out_f32, ref, rtol=2e-3, atol=2e-3), (
        f"f32 max abs err = {jnp.max(jnp.abs(out_f32 - ref))}"
    )

    # bf16 MXU path (default perf path on v6e/v7x): looser tolerance for bf16 operands.
    dec_bf16 = make_decoder_layer(B, C_in, C_out, L, stride, K, compute_dtype=jnp.bfloat16)
    out_bf16 = jax.block_until_ready(dec_bf16(x, w, bias, gamma, beta))
    assert out_bf16.shape == (B, C_out, L_out)
    assert jnp.allclose(out_bf16, ref, rtol=5e-2, atol=5e-2), (
        f"bf16 max abs err = {jnp.max(jnp.abs(out_bf16 - ref))}"
    )

    print("KERNEL_OK")
</pallas_src>

<mosaic_0001>
module attributes {stable_mosaic.version = 11 : i64} {
  func.func @kernel(%arg0: i32, %arg1: memref<16x16xf32, #tpu.memory_space<vmem>>, %arg2: memref<16x128xf32, #tpu.memory_space<vmem>>, %arg3: memref<16x1xf32, #tpu.memory_space<vmem>>, %arg4: memref<16x1xf32, #tpu.memory_space<vmem>>, %arg5: memref<16x1xf32, #tpu.memory_space<vmem>>, %arg6: memref<16x128xf32, #tpu.memory_space<vmem>>) attributes {dimension_semantics = [#tpu.dimension_semantics<parallel>], iteration_bounds = array<i64: 1>, scalar_prefetch = 0 : i64, scratch_operands = 0 : i64, tpu.core_type = #tpu.core_type<tc>, window_params = [{pipeline_mode = #tpu.pipeline_mode<synchronous>, transform_indices = @transform_0, window_bounds = array<i64: 16, 16>}, {transform_indices = @transform_1, window_bounds = array<i64: 16, 128>}, {pipeline_mode = #tpu.pipeline_mode<synchronous>, transform_indices = @transform_2, window_bounds = array<i64: 16, 1>}, {pipeline_mode = #tpu.pipeline_mode<synchronous>, transform_indices = @transform_3, window_bounds = array<i64: 16, 1>}, {pipeline_mode = #tpu.pipeline_mode<synchronous>, transform_indices = @transform_4, window_bounds = array<i64: 16, 1>}, {transform_indices = @transform_5, window_bounds = array<i64: 16, 128>}]} {
    %c0 = arith.constant 0 : index
    %c0_0 = arith.constant 0 : index
    %0 = vector.load %arg1[%c0, %c0_0] : memref<16x16xf32, #tpu.memory_space<vmem>>, vector<16x16xf32>
    %c0_1 = arith.constant 0 : index
    %c0_2 = arith.constant 0 : index
    %1 = vector.load %arg2[%c0_1, %c0_2] : memref<16x128xf32, #tpu.memory_space<vmem>>, vector<16x128xf32>
    %cst = arith.constant dense<0.000000e+00> : vector<16x128xf32>
    %2 = tpu.matmul %0, %1, %cst {dimension_numbers = #tpu.dot_dimension_numbers<[1], [0], [0], [1], [0, 0, 1, 1], [], []>} : vector<16x16xf32>, vector<16x128xf32>, vector<16x128xf32> -> vector<16x128xf32>
    %c0_3 = arith.constant 0 : index
    %c0_4 = arith.constant 0 : index
    %3 = vector.load %arg3[%c0_3, %c0_4] : memref<16x1xf32, #tpu.memory_space<vmem>>, vector<16x1xf32>
    %4 = vector.broadcast %3 : vector<16x1xf32> to vector<16x128xf32>
    %5 = arith.addf %2, %4 : vector<16x128xf32>
    %c0_5 = arith.constant 0 : index
    %c0_6 = arith.constant 0 : index
    %6 = vector.load %arg4[%c0_5, %c0_6] : memref<16x1xf32, #tpu.memory_space<vmem>>, vector<16x1xf32>
    %c0_7 = arith.constant 0 : index
    %c0_8 = arith.constant 0 : index
    %7 = vector.load %arg5[%c0_7, %c0_8] : memref<16x1xf32, #tpu.memory_space<vmem>>, vector<16x1xf32>
    %8 = vector.extract_strided_slice %5 {offsets = [0, 0], sizes = [8, 128], strides = [1, 1]} : vector<16x128xf32> to vector<8x128xf32>
    %cst_9 = arith.constant dense<0.000000e+00> : vector<128xf32>
    %9 = vector.multi_reduction <add>, %8, %cst_9 [0] : vector<8x128xf32> to vector<128xf32>
    %10 = vector.shape_cast %9 : vector<128xf32> to vector<1x128xf32>
    %cst_10 = arith.constant 1.250000e-01 : f32
    %11 = vector.broadcast %cst_10 : f32 to vector<1x128xf32>
    %12 = arith.mulf %10, %11 : vector<1x128xf32>
    %13 = arith.mulf %8, %8 : vector<8x128xf32>
    %cst_11 = arith.constant dense<0.000000e+00> : vector<128xf32>
    %14 = vector.multi_reduction <add>, %13, %cst_11 [0] : vector<8x128xf32> to vector<128xf32>
    %15 = vector.shape_cast %14 : vector<128xf32> to vector<1x128xf32>
    %cst_12 = arith.constant 1.250000e-01 : f32
    %16 = vector.broadcast %cst_12 : f32 to vector<1x128xf32>
    %17 = arith.mulf %15, %16 : vector<1x128xf32>
    %18 = arith.mulf %12, %12 : vector<1x128xf32>
    %19 = arith.subf %17, %18 : vector<1x128xf32>
    %cst_13 = arith.constant 0.000000e+00 : f32
    %20 = vector.broadcast %cst_13 : f32 to vector<1x128xf32>
    %21 = arith.maximumf %19, %20 : vector<1x128xf32>
    %22 = vector.broadcast %12 : vector<1x128xf32> to vector<8x128xf32>
    %23 = arith.subf %8, %22 : vector<8x128xf32>
    %cst_14 = arith.constant 9.99999974E-6 : f32
    %24 = vector.broadcast %cst_14 : f32 to vector<1x128xf32>
    %25 = arith.addf %21, %24 : vector<1x128xf32>
    %26 = math.rsqrt %25 : vector<1x128xf32>
    %27 = vector.broadcast %26 : vector<1x128xf32> to vector<8x128xf32>
    %28 = arith.mulf %23, %27 : vector<8x128xf32>
    %29 = vector.extract_strided_slice %6 {offsets = [0, 0], sizes = [8, 1], strides = [1, 1]} : vector<16x1xf32> to vector<8x1xf32>
    %30 = vector.broadcast %29 : vector<8x1xf32> to vector<8x128xf32>
    %31 = arith.mulf %28, %30 : vector<8x128xf32>
    %32 = vector.extract_strided_slice %7 {offsets = [0, 0], sizes = [8, 1], strides = [1, 1]} : vector<16x1xf32> to vector<8x1xf32>
    %33 = vector.broadcast %32 : vector<8x1xf32> to vector<8x128xf32>
    %34 = arith.addf %31, %33 : vector<8x128xf32>
    %cst_15 = arith.constant 0.000000e+00 : f32
    %35 = vector.broadcast %cst_15 : f32 to vector<8x128xf32>
    %36 = arith.maximumf %34, %35 : vector<8x128xf32>
    %c0_16 = arith.constant 0 : index
    %c0_17 = arith.constant 0 : index
    %37 = vector.load %arg6[%c0_16, %c0_17] : memref<16x128xf32, #tpu.memory_space<vmem>>, vector<8x128xf32>
    tpu.vector_store %arg6[%c0_16, %c0_17], %36 {strides = array<i32>} : memref<16x128xf32, #tpu.memory_space<vmem>>, vector<8x128xf32>,
    %38 = vector.extract_strided_slice %5 {offsets = [8, 0], sizes = [8, 128], strides = [1, 1]} : vector<16x128xf32> to vector<8x128xf32>
    %cst_18 = arith.constant dense<0.000000e+00> : vector<128xf32>
    %39 = vector.multi_reduction <add>, %38, %cst_18 [0] : vector<8x128xf32> to vector<128xf32>
    %40 = vector.shape_cast %39 : vector<128xf32> to vector<1x128xf32>
    %cst_19 = arith.constant 1.250000e-01 : f32
    %41 = vector.broadcast %cst_19 : f32 to vector<1x128xf32>
    %42 = arith.mulf %40, %41 : vector<1x128xf32>
    %43 = arith.mulf %38, %38 : vector<8x128xf32>
    %cst_20 = arith.constant dense<0.000000e+00> : vector<128xf32>
    %44 = vector.multi_reduction <add>, %43, %cst_20 [0] : vector<8x128xf32> to vector<128xf32>
    %45 = vector.shape_cast %44 : vector<128xf32> to vector<1x128xf32>
    %cst_21 = arith.constant 1.250000e-01 : f32
    %46 = vector.broadcast %cst_21 : f32 to vector<1x128xf32>
    %47 = arith.mulf %45, %46 : vector<1x128xf32>
    %48 = arith.mulf %42, %42 : vector<1x128xf32>
    %49 = arith.subf %47, %48 : vector<1x128xf32>
    %cst_22 = arith.constant 0.000000e+00 : f32
    %50 = vector.broadcast %cst_22 : f32 to vector<1x128xf32>
    %51 = arith.maximumf %49, %50 : vector<1x128xf32>
    %52 = vector.broadcast %42 : vector<1x128xf32> to vector<8x128xf32>
    %53 = arith.subf %38, %52 : vector<8x128xf32>
    %cst_23 = arith.constant 9.99999974E-6 : f32
    %54 = vector.broadcast %cst_23 : f32 to vector<1x128xf32>
    %55 = arith.addf %51, %54 : vector<1x128xf32>
    %56 = math.rsqrt %55 : vector<1x128xf32>
    %57 = vector.broadcast %56 : vector<1x128xf32> to vector<8x128xf32>
    %58 = arith.mulf %53, %57 : vector<8x128xf32>
    %59 = vector.extract_strided_slice %6 {offsets = [8, 0], sizes = [8, 1], strides = [1, 1]} : vector<16x1xf32> to vector<8x1xf32>
    %60 = vector.broadcast %59 : vector<8x1xf32> to vector<8x128xf32>
    %61 = arith.mulf %58, %60 : vector<8x128xf32>
    %62 = vector.extract_strided_slice %7 {offsets = [8, 0], sizes = [8, 1], strides = [1, 1]} : vector<16x1xf32> to vector<8x1xf32>
    %63 = vector.broadcast %62 : vector<8x1xf32> to vector<8x128xf32>
    %64 = arith.addf %61, %63 : vector<8x128xf32>
    %cst_24 = arith.constant 0.000000e+00 : f32
    %65 = vector.broadcast %cst_24 : f32 to vector<8x128xf32>
    %66 = arith.maximumf %64, %65 : vector<8x128xf32>
    %c8 = arith.constant 8 : index
    %c0_25 = arith.constant 0 : index
    %67 = vector.load %arg6[%c8, %c0_25] : memref<16x128xf32, #tpu.memory_space<vmem>>, vector<8x128xf32>
    tpu.vector_store %arg6[%c8, %c0_25], %66 {strides = array<i32>} : memref<16x128xf32, #tpu.memory_space<vmem>>, vector<8x128xf32>,
    return
  }
  func.func @transform_0(%arg0: i32) -> (i32, i32) {
    %c0_i32 = arith.constant 0 : i32
    %c0_i32_0 = arith.constant 0 : i32
    %c0_i32_1 = arith.constant 0 : i32
    return %c0_i32, %c0_i32_0 : i32, i32
  }
  func.func @transform_1(%arg0: i32) -> (i32, i32) {
    %c0_i32 = arith.constant 0 : i32
    %c0_i32_0 = arith.constant 0 : i32
    return %c0_i32, %arg0 : i32, i32
  }
  func.func @transform_2(%arg0: i32) -> (i32, i32) {
    %c0_i32 = arith.constant 0 : i32
    %c0_i32_0 = arith.constant 0 : i32
    %c0_i32_1 = arith.constant 0 : i32
    return %c0_i32, %c0_i32_0 : i32, i32
  }
  func.func @transform_3(%arg0: i32) -> (i32, i32) {
    %c0_i32 = arith.constant 0 : i32
    %c0_i32_0 = arith.constant 0 : i32
    %c0_i32_1 = arith.constant 0 : i32
    return %c0_i32, %c0_i32_0 : i32, i32
  }
  func.func @transform_4(%arg0: i32) -> (i32, i32) {
    %c0_i32 = arith.constant 0 : i32
    %c0_i32_0 = arith.constant 0 : i32
    %c0_i32_1 = arith.constant 0 : i32
    return %c0_i32, %c0_i32_0 : i32, i32
  }
  func.func @transform_5(%arg0: i32) -> (i32, i32) {
    %c0_i32 = arith.constant 0 : i32
    %c0_i32_0 = arith.constant 0 : i32
    return %c0_i32, %arg0 : i32, i32
  }
}

</mosaic_0001>

<bundles_post_ra>
// kernel: tile.18
= control target key start
LH: loop header
LB: loop body
LE: loop exit
PB: predicated region body
PF: predicated region fallthrough
CT: control target
= control target key end

     0   :  { %s22_s0 = inlined_call_operand.vmem [shape: f32[8], index: 0, kind: input, shape index: {}]   ;;  %s23_s1 = inlined_call_operand.vmem [shape: f32[2,8], index: 1, kind: output, shape index: {}]  }
   0x1   :  { %v4_v0 = vld [vmem:[%s22_s0] ss:$0 sm:$0xff] }
   0x2   :  { %5 = vst [vmem:[%s23_s1] sm:$0x3] %v4_v0 }

// kernel: tile.0
= control target key start
LH: loop header
LB: loop body
LE: loop exit
PB: predicated region body
PF: predicated region fallthrough
CT: control target
= control target key end

     0   :  { %s66_s8 = smov 125   ;;  %s67_s9 = smov 123   ;;  %vm7_vm0 = vcmask 7168   ;;  %s117_s0 = inlined_call_operand.vmem [shape: f32[2,8], index: 0, kind: input, shape index: {}]   ;;  %s118_s1 = inlined_call_operand.vmem [shape: f32[16,1], index: 1, kind: output, shape index: {}]  }
   0x1   :  { %v4_v0 = vld [vmem:[%s117_s0] sm:$0x3]  ;;  %s65_s0 = smov 127   ;;  %s68_s10 = smov 126  }
   0x2   :  { %5 = vst [vmem:[#allocation0] sm:$0x3] %v4_v0  ;;  %s69_s11 = smov 124   ;;  %s70_s12 = smov 122  }
   0x3   :  { %s71_s13 = smov 121  }
   0x9   :  { %v9_v1 = vld [vmem:[#allocation0] sm:$0x3]  }
   0xa   :  { %v21_v2 = vld [vmem:[#allocation0] sm:$0x3]   ;;  %10 = vrot.lane.b32.xlu0 %v9_v1, %s65_s0 }
   0xb   :  { %22 = vrot.lane.b32.xlu1 %v21_v2, %s66_s8  ;;  %v33_v3 = vld [vmem:[#allocation0] sm:$0x3]  }
   0xc   :  { %34 = vrot.lane.b32.xlu2 %v33_v3, %s67_s9  ;;  %v15_v4 = vld [vmem:[#allocation0] sm:$0x3]  }
   0xd   :  { %v27_v5 = vld [vmem:[#allocation0] sm:$0x3]  }
   0xe   :  { %v39_v6 = vld [vmem:[#allocation0] sm:$0x3]  }
   0xf   :  { %v45_v7 = vld [vmem:[#allocation0] sm:$0x3]  }
  0x10   :  { %v6_v8 = vld [vmem:[#allocation0] sm:$0x3]  }
  0x11   :  { %8 = vst.msk [vmem:[%s118_s1] ss:$8 sm:$0x3] %vm7_vm0, %v6_v8  }
  0x12   :  { %16 = vrot.lane.b32.xlu0 %v15_v4, %s68_s10 }
  0x13   :  { %28 = vrot.lane.b32.xlu1 %v27_v5, %s69_s11 }
  0x14   :  { %40 = vrot.lane.b32.xlu2 %v39_v6, %s70_s12 }
  0x1a   :  { %46 = vrot.lane.b32.xlu0 %v45_v7, %s71_s13 }
  0x66   :  { %v35_v9 = vpop.permute.xlu2 %34  }
  0x67   :  { %55 = vst.msk [vmem:[%s118_s1 + $0x5] ss:$8 sm:$0x3] %vm7_vm0, %v35_v9  }
  0x6e   :  { %v41_v10 = vpop.permute.xlu2 %40  }
  0x6f   :  { %56 = vst.msk [vmem:[%s118_s1 + $0x6] ss:$8 sm:$0x3] %vm7_vm0, %v41_v10  }
  0x7c   :  { %v11_v11 = vpop.permute.xlu0 %10  }
  0x7d   :  { %v23_v12 = vpop.permute.xlu1 %22   ;;  %51 = vst.msk [vmem:[%s118_s1 + $0x1] ss:$8 sm:$0x3] %vm7_vm0, %v11_v11  }
  0x7e   :  { %53 = vst.msk [vmem:[%s118_s1 + $0x3] ss:$8 sm:$0x3] %vm7_vm0, %v23_v12  }
  0x84   :  { %v17_v13 = vpop.permute.xlu0 %16  }
  0x85   :  { %v29_v14 = vpop.permute.xlu1 %28   ;;  %52 = vst.msk [vmem:[%s118_s1 + $0x2] ss:$8 sm:$0x3] %vm7_vm0, %v17_v13  }
  0x86   :  { %54 = vst.msk [vmem:[%s118_s1 + $0x4] ss:$8 sm:$0x3] %vm7_vm0, %v29_v14  }
  0x8c   :  { %v47_v15 = vpop.permute.xlu0 %46  }
  0x8d   :  { %57 = vst.msk [vmem:[%s118_s1 + $0x7] ss:$8 sm:$0x3] %vm7_vm0, %v47_v15  }

// kernel: apply.1
= control target key start
LH: loop header
LB: loop body
LE: loop exit
PB: predicated region body
PF: predicated region fallthrough
CT: control target
= control target key end

     0   :  { %v176_v0 = vmov 0   ;;  %vm36_vm0 = vcmask 130048   ;;  %s257_s2 = inlined_call_operand.vmem [shape: f32[16,1], index: 2, kind: input, shape index: {}]   ;;  %s258_s1 = inlined_call_operand.vmem [shape: f32[16,128], index: 1, kind: input, shape index: {}]   ;;  %s259_s0 = inlined_call_operand.vmem [shape: f32[16,16], index: 0, kind: input, shape index: {}]   ;;  %s260_s3 = inlined_call_operand.vmem [shape: f32[16,1], index: 3, kind: input, shape index: {}]   ;;  %s261_s4 = inlined_call_operand.vmem [shape: f32[16,1], index: 4, kind: input, shape index: {}]   ;;  %s262_s5 = inlined_call_operand.vmem [shape: f32[16,128], index: 5, kind: output, shape index: {}]  }
   0x1   :  { %169 = vset.pattern.permute.xlu0 %v176_v0  ;;  %v24_v1 = vld [vmem:[%s257_s2] sm:$0xff]  ;;  %v23_v2 = vld [vmem:[%s258_s1 + $0x8] sm:$0xff]  ;;  %170 = vset.pattern.permute.xlu1 %v176_v0 }
   0x2   :  { %v22_v3 = vld [vmem:[%s258_s1] sm:$0xff]  ;;  %28 = vperm.xlu0 %169, %v24_v1   ;;  %57 = vmatpush.msra.mxu0 %v23_v2  ;;  %v21_v5 = vld [vmem:[%s259_s0 + $0x8] sm:$0xff] }
   0x3   :  { %v20_v4 = vld [vmem:[%s259_s0] sm:$0xff]  ;;  %166 = vmatpush.msra.mxu1 %v23_v2  ;;  %171 = vset.pattern.permute.xlu2 %v176_v0  ;;  %v25_v8 = vld [vmem:[%s257_s2 + $0x8] sm:$0xff] }
   0x4   :  { %v66_v6 = vld [vmem:[%s260_s3] sm:$0xff]  ;;  %58 = vmatpush.msra.mxu0 %v22_v3  ;;  %v67_v9 = vld [vmem:[%s260_s3 + $0x8] sm:$0xff] }
   0x5   :  { %v68_v7 = vld [vmem:[%s261_s4] sm:$0xff]  ;;  %103 = vperm.xlu1 %170, %v66_v6   ;;  %167 = vmatpush.msra.mxu1 %v22_v3  ;;  %v69_v10 = vld [vmem:[%s261_s4 + $0x8] sm:$0xff] }
   0x6   :  { %164 = vmatmul.msk.f32.vlgmr.msra.gmra.mxu0 %vm36_vm0, %v20_v4  ;;  %165 = vmatmul.msk.f32.vlgmr.msra.gmra.mxu1 %vm36_vm0, %v21_v5 }
   0x7   :  { %109 = vperm.xlu2 %171, %v68_v7  }
   0xa   :  { %33 = vperm.xlu0 %169, %v25_v8  }
   0xd   :  { %148 = vperm.xlu1 %170, %v67_v9  }
   0xf   :  { %154 = vperm.xlu2 %171, %v69_v10  }
  0x61   :  { %v110_v63 = vpop.permute.xlu2 %109 }
  0x74   :  { %v29_v11 = vpop.permute.xlu0 %28 }
  0x77   :  { %v104_v60 = vpop.permute.xlu1 %103 }
  0x7c   :  { %v34_v13 = vpop.permute.xlu0 %33 }
  0x83   :  { %v60_v12 = vpop.f32.mrf.mxu0  ;;  %v63_v15 = vpop.f32.mrf.mxu1 }
  0x84   :  { %v237_v14 = vadd.f32 %v60_v12, %v29_v11  ;;  %v239_v16 = vadd.f32 %v63_v15, %v34_v13  ;;  %v149_v12 = vpop.permute.xlu1 %148 }
  0x86   :  { %v70_v17 = vrot.slane %v237_v14, 4  ;;  %v77_v18 = vmul.f32 %v237_v14, %v237_v14  ;;  %v115_v19 = vrot.slane %v239_v16, 4  ;;  %v122_v20 = vmul.f32 %v239_v16, %v239_v16 }
  0x88   :  { %v71_v21 = vadd.f32 %v70_v17, %v237_v14  ;;  %v78_v22 = vrot.slane %v77_v18, 4  ;;  %v116_v23 = vadd.f32 %v115_v19, %v239_v16  ;;  %v123_v24 = vrot.slane %v122_v20, 4  ;;  %v155_v17 = vpop.permute.xlu2 %154 }
  0x8a   :  { %v72_v25 = vrot.slane %v71_v21, 2  ;;  %v79_v26 = vadd.f32 %v78_v22, %v77_v18  ;;  %v117_v27 = vrot.slane %v116_v23, 2  ;;  %v124_v28 = vadd.f32 %v123_v24, %v122_v20 }
  0x8c   :  { %v80_v29 = vrot.slane %v79_v26, 2  ;;  %v73_v30 = vadd.f32 %v72_v25, %v71_v21  ;;  %v125_v31 = vrot.slane %v124_v28, 2  ;;  %v118_v32 = vadd.f32 %v117_v27, %v116_v23 }
  0x8e   :  { %v81_v33 = vadd.f32 %v80_v29, %v79_v26  ;;  %v74_v34 = vrot.slane %v73_v30, 1  ;;  %v126_v35 = vadd.f32 %v125_v31, %v124_v28  ;;  %v119_v36 = vrot.slane %v118_v32, 1 }
  0x90   :  { %v82_v37 = vrot.slane %v81_v33, 1  ;;  %v75_v38 = vadd.f32 %v74_v34, %v73_v30  ;;  %v127_v39 = vrot.slane %v126_v35, 1  ;;  %v120_v40 = vadd.f32 %v119_v36, %v118_v32 }
  0x92   :  { %v76_v41 = vmul.f32 0.125, %v75_v38  ;;  %v83_v42 = vadd.f32 %v82_v37, %v81_v33  ;;  %v121_v43 = vmul.f32 0.125, %v120_v40  ;;  %v128_v44 = vadd.f32 %v127_v39, %v126_v35 }
  0x94   :  { %v84_v45 = vmul.f32 0.125, %v83_v42  ;;  %v85_v46 = vmul.f32 %v76_v41, %v76_v41  ;;  %v129_v47 = vmul.f32 0.125, %v128_v44  ;;  %v130_v48 = vmul.f32 %v121_v43, %v121_v43 }
  0x95   :  { %v88_v4 = vsub.f32 %v237_v14, %v76_v41  ;;  %v133_v7 = vsub.f32 %v239_v16, %v121_v43 }
  0x96   :  { %v86_v49 = vsub.f32 %v84_v45, %v85_v46  ;;  %v131_v50 = vsub.f32 %v129_v47, %v130_v48 }
  0x98   :  { %v87_v51 = vmax.f32 %v86_v49, 0.0  ;;  %v132_v52 = vmax.f32 %v131_v50, 0.0 }
  0x9a   :  { %v89_v53 = vadd.f32 1e-05, %v87_v51  ;;  %v134_v54 = vadd.f32 1e-05, %v132_v52 }
  0x9c   :  { %172 = vrsqrt.f32 %v89_v53  ;;  %vm96_vm3 = vweird.f32 %v89_v53  ;;  %vm141_vm5 = vweird.f32 %v134_v54 }
  0x9d   :  { %174 = vrsqrt.f32 %v134_v54 }
  0xa2   :  { %v173_v55 = vpop.eup %172 }
  0xa3   :  { %v175_v56 = vpop.eup %174  ;;  %v91_v57 = vmul.f32 %v173_v55, %v89_v53  ;;  %vm97_vm1 = vweird.f32 %v173_v55 }
  0xa4   :  { %v136_v58 = vmul.f32 %v175_v56, %v134_v54  ;;  %vm142_vm2 = vweird.f32 %v175_v56  ;;  %vm98_vm4 = vmor %vm96_vm3, %vm97_vm1 }
  0xa5   :  { %v92_v59 = vmul.f32 %v173_v55, %v91_v57  ;;  %vm143_vm6 = vmor %vm141_vm5, %vm142_vm2 }
  0xa6   :  { %v137_v61 = vmul.f32 %v175_v56, %v136_v58 }
  0xa7   :  { %v93_v62 = vmul.f32 0.5, %v92_v59 }
  0xa8   :  { %v138_v0 = vmul.f32 0.5, %v137_v61 }
  0xa9   :  { %v94_v1 = vsub.f32 1.5, %v93_v62 }
  0xaa   :  { %v139_v2 = vsub.f32 1.5, %v138_v0 }
  0xab   :  { %v95_v3 = vmul.f32 %v173_v55, %v94_v1 }
  0xac   :  { %v140_v5 = vmul.f32 %v175_v56, %v139_v2 }
  0xad   :  { %v99_v6 = vsel %vm98_vm4, %v173_v55, %v95_v3 }
  0xae   :  { %v100_v8 = vmul.f32 %v99_v6, %v88_v4  ;;  %v144_v9 = vsel %vm143_vm6, %v175_v56, %v140_v5 }
  0xaf   :  { %v145_v10 = vmul.f32 %v144_v9, %v133_v7 }
  0xb0   :  { %v106_v11 = vmul.f32 %v104_v60, %v100_v8 }
  0xb1   :  { %v151_v13 = vmul.f32 %v149_v12, %v145_v10 }
  0xb2   :  { %v112_v15 = vadd.f32 %v110_v63, %v106_v11 }
  0xb3   :  { %v157_v18 = vadd.f32 %v155_v17, %v151_v13 }
  0xb4   :  { %v113_v19 = vmax.f32 %v112_v15, 0.0 }
  0xb5   :  { %v158_v20 = vmax.f32 %v157_v18, 0.0 }
  0xb6   :  { %114 = vst [vmem:[%s262_s5] sm:$0xff] %v113_v19 }
  0xb7   :  { %159 = vst [vmem:[%s262_s5 + $0x8] sm:$0xff] %v158_v20 }

</bundles_post_ra>
